<compile_context>
chip_gen: v6e
topology: v6e:2x2x1
jax: 0.10.0
libtpu: 0.0.40
codegen_flags: <defaults>
</compile_context>

<pallas_src>
import functools

import numpy as np
import jax
import jax.numpy as jnp
from jax.experimental import pallas as pl
from jax.experimental.pallas import tpu as pltpu


def _round_up(x, m):
    return ((x + m - 1) // m) * m


# ----------------------------------------------------------------------------
# Kernel 1: patch-embedding GEMM (stand-in backbone hot path)
#   A (M, Kd) bf16 @ W (Kd, C) bf16 -> f32 acc, + bias (f32) -> tokens (M, C) f32
# ----------------------------------------------------------------------------
def _matmul_bias_kernel(a_ref, b_ref, bias_ref, o_ref, acc_ref):
    k = pl.program_id(2)

    @pl.when(k == 0)
    def _():
        acc_ref[...] = jnp.zeros_like(acc_ref)

    acc_ref[...] += jnp.dot(a_ref[...], b_ref[...],
                            preferred_element_type=jnp.float32)

    @pl.when(k == pl.num_programs(2) - 1)
    def _():
        o_ref[...] = (acc_ref[...] + bias_ref[...]).astype(o_ref.dtype)


def patch_embed_matmul(patches, w, bias, *, tm, tn, tk):
    """patches (M, Kd), w (Kd, N), bias (1, N) -> (M, N) f32.

    Operands are cast to bf16; inputs are zero-padded up to tile multiples so
    no remainder rows/cols are dropped; the result is sliced back to (M, N).
    """
    M, Kd = patches.shape
    _, N = w.shape
    Mp, Np, Kp = _round_up(M, tm), _round_up(N, tn), _round_up(Kd, tk)

    a = patches.astype(jnp.bfloat16)
    b = w.astype(jnp.bfloat16)
    bias2 = bias.reshape(1, N).astype(jnp.float32)
    if (Mp, Kp) != (M, Kd):
        a = jnp.pad(a, ((0, Mp - M), (0, Kp - Kd)))
    if (Kp, Np) != (Kd, N):
        b = jnp.pad(b, ((0, Kp - Kd), (0, Np - N)))
    if Np != N:
        bias2 = jnp.pad(bias2, ((0, 0), (0, Np - N)))

    grid = (pl.cdiv(Mp, tm), pl.cdiv(Np, tn), pl.cdiv(Kp, tk))
    out = pl.pallas_call(
        _matmul_bias_kernel,
        out_shape=jax.ShapeDtypeStruct((Mp, Np), jnp.float32),
        grid_spec=pltpu.PrefetchScalarGridSpec(
            num_scalar_prefetch=0,
            grid=grid,
            in_specs=[
                pl.BlockSpec((tm, tk), lambda i, j, k: (i, k)),
                pl.BlockSpec((tk, tn), lambda i, j, k: (k, j)),
                pl.BlockSpec((1, tn), lambda i, j, k: (0, j)),
            ],
            out_specs=pl.BlockSpec((tm, tn), lambda i, j, k: (i, j)),
            scratch_shapes=[pltpu.VMEM((tm, tn), jnp.float32)],
        ),
        compiler_params=pltpu.CompilerParams(
            dimension_semantics=("parallel", "parallel", "arbitrary"),
            vmem_limit_bytes=48 * 1024 * 1024),
    )(a, b, bias2)
    return out[:M, :N]


# ----------------------------------------------------------------------------
# Kernel 2: LWTGPF head (per-batch grid step, all f32)
#   tokens block (1, N, C) x pool_mat (K, N) -> pooled (K, C)
#   (row 0 = global mean over all N tokens; rows 1.. = adaptive part pools)
#   then folded BN-neck (eval) scale/shift and L2 normalization over C,
#   single lane-dense full-block store per grid step.
# ----------------------------------------------------------------------------
def _head_kernel(x_ref, m_ref, scale_ref, shift_ref, o_ref, *, eps_norm):
    x = x_ref[0]                                            # (N, C) f32
    pooled = jnp.dot(m_ref[...], x,
                     preferred_element_type=jnp.float32)    # (K, C)
    y = pooled * scale_ref[...] + shift_ref[...]            # folded BN (eval)
    sumsq = jnp.sum(y * y, axis=-1, keepdims=True)
    inv = jax.lax.rsqrt(jnp.maximum(sumsq, eps_norm * eps_norm))  # EUP rsqrt
    o_ref[0] = y * inv                                      # full-block store


def lwtgpf_head(tokens, pool_mat, scale, shift, *, eps_norm=1e-12):
    B, N, C = tokens.shape
    K = pool_mat.shape[0]
    out = pl.pallas_call(
        functools.partial(_head_kernel, eps_norm=eps_norm),
        out_shape=jax.ShapeDtypeStruct((B, K, C), jnp.float32),
        grid_spec=pltpu.PrefetchScalarGridSpec(
            num_scalar_prefetch=0,
            grid=(B,),
            in_specs=[
                pl.BlockSpec((1, N, C), lambda b: (b, 0, 0)),
                pl.BlockSpec((K, N), lambda b: (0, 0)),
                pl.BlockSpec((K, C), lambda b: (0, 0)),
                pl.BlockSpec((K, C), lambda b: (0, 0)),
            ],
            out_specs=pl.BlockSpec((1, K, C), lambda b: (b, 0, 0)),
        ),
        compiler_params=pltpu.CompilerParams(
            dimension_semantics=("parallel",)),
    )(tokens, pool_mat, scale, shift)
    return out.transpose(1, 0, 2)        # (K, B, C)


# ----------------------------------------------------------------------------
# Pooling-matrix construction (reproduces AdaptiveAvgPool1d(1) and
# AdaptiveAvgPool2d((g, 1)) bin semantics exactly).
# ----------------------------------------------------------------------------
def _adaptive_bins(in_size, out_size):
    return [((i * in_size) // out_size, -((-(i + 1) * in_size) // out_size))
            for i in range(out_size)]


def build_pool_matrix(fmap_h, fmap_w, granularities):
    n = fmap_h * fmap_w
    rows = [np.full((n,), 1.0 / n, np.float32)]            # global avg pool
    for g in granularities:                                 # b1_pool, b2_pool, ...
        for (s, e) in _adaptive_bins(fmap_h, g):
            w = np.zeros((fmap_h, fmap_w), np.float32)
            w[s:e, :] = 1.0 / ((e - s) * fmap_w)
            rows.append(w.reshape(-1))
    return jnp.asarray(np.stack(rows, axis=0))              # (1 + num_parts, N)


# ----------------------------------------------------------------------------
# Full forward (glue = patchify reshape + BN fold; compute = Pallas kernels)
# ----------------------------------------------------------------------------
def lwtgpf_forward(x_img, w_embed, b_embed, pool_mat, gamma, beta, mu, var,
                   *, fmap_h, fmap_w, feat_dim, eps_bn=1e-5):
    B = x_img.shape[0]
    N = fmap_h * fmap_w
    patch = 32
    # patchify (glue) in bf16 so the (B*N, 3*32*32) HBM intermediate is halved
    p = x_img.astype(jnp.bfloat16).reshape(B, 3, fmap_h, patch, fmap_w, patch)
    p = p.transpose(0, 2, 4, 1, 3, 5).reshape(B * N, 3 * patch * patch)
    # TODO(synk): fuse the patch gather into the GEMM A-side index_map to avoid
    #             materializing the patchified activation in HBM at all.

    M, Kd, C = B * N, 3 * patch * patch, feat_dim
    # Tile choice: tm<=256, tn multiple of 128 (256 when C is wide, e.g. real
    # Swin-S C=768); prefer at least one parallel grid axis of extent >= 2.
    tm = 256 if M >= 256 else _round_up(M, 8)
    if M >= 2 * tm:
        tn = 256 if C >= 256 else _round_up(C, 128)
    else:
        tn = 256 if C >= 512 else (128 if C >= 256 else _round_up(C, 128))
    tk = 512 if Kd >= 512 else _round_up(Kd, 128)

    tokens = patch_embed_matmul(p, w_embed, b_embed, tm=tm, tn=tn, tk=tk)
    tokens = tokens.reshape(B, N, C)                       # (B, N, C) f32

    # Fold eval-mode BatchNorm1d into a scale/shift per (k, c).
    scale = gamma * jax.lax.rsqrt(var + eps_bn)            # (K, C)
    shift = beta - mu * scale                              # (K, C)

    out = lwtgpf_head(tokens, pool_mat, scale, shift)      # (K, B, C)
    return {"global": out[0], "part": out[1:]}, tokens


# ----------------------------------------------------------------------------
# Pure-JAX references for sanity checks.
# ----------------------------------------------------------------------------
def head_reference(tokens, pool_mat, gamma, beta, mu, var):
    pooled = jnp.einsum("kn,bnc->kbc", pool_mat, tokens)
    y = (pooled - mu[:, None, :]) * jax.lax.rsqrt(var[:, None, :] + 1e-5) \
        * gamma[:, None, :] + beta[:, None, :]
    nrm = jnp.sqrt(jnp.sum(y * y, axis=-1, keepdims=True))
    return y / jnp.maximum(nrm, 1e-12)


if __name__ == "__main__":
    # Small shapes consistent with the module: image divisible by 32,
    # fmap = (H//32, W//32), granularities sum to num_parts.
    B = 2
    img_h, img_w = 256, 128
    fmap_h, fmap_w = img_h // 32, img_w // 32          # 8, 4
    N = fmap_h * fmap_w                                # 32 tokens
    C = 256                                            # stand-in for num_features[-1]
    granularities = (2, 3)
    num_parts = sum(granularities)                     # 5

    key = jax.random.PRNGKey(0)
    k1, k2 = jax.random.split(key)
    x_img = jax.random.normal(k1, (B, 3, img_h, img_w), jnp.float32)

    # Stand-in backbone (patch embed) parameters, deterministic.
    patch_dim = 3 * 32 * 32
    w_embed = jax.random.normal(k2, (patch_dim, C), jnp.float32) / np.sqrt(patch_dim)
    b_embed = jnp.zeros((1, C), jnp.float32)

    # BN-neck parameters: weights_init_kaiming => weight=1, bias=0;
    # fresh BN running stats => mean=0, var=1 (eval mode).
    K = 1 + num_parts
    gamma = jnp.ones((K, C), jnp.float32)
    beta = jnp.zeros((K, C), jnp.float32)
    mu = jnp.zeros((K, C), jnp.float32)
    var = jnp.ones((K, C), jnp.float32)

    pool_mat = build_pool_matrix(fmap_h, fmap_w, granularities)

    out, tokens = lwtgpf_forward(
        x_img, w_embed, b_embed, pool_mat, gamma, beta, mu, var,
        fmap_h=fmap_h, fmap_w=fmap_w, feat_dim=C)
    jax.block_until_ready(out)

    assert out["global"].shape == (B, C)
    assert out["part"].shape == (num_parts, B, C)

    # Sanity 1: Pallas GEMM (bf16 operands, f32 acc) vs plain-JAX bf16 GEMM.
    p_ref = x_img.astype(jnp.bfloat16).reshape(B, 3, fmap_h, 32, fmap_w, 32)
    p_ref = p_ref.transpose(0, 2, 4, 1, 3, 5).reshape(B * N, patch_dim)
    tok_ref = jnp.dot(p_ref, w_embed.astype(jnp.bfloat16),
                      preferred_element_type=jnp.float32) + b_embed
    np.testing.assert_allclose(np.asarray(tokens.reshape(B * N, C)),
                               np.asarray(tok_ref), rtol=1e-2, atol=1e-2)

    # Sanity 2: Pallas head vs plain-JAX reference on the same tokens.
    ref = head_reference(tokens, pool_mat, gamma, beta, mu, var)
    got = jnp.concatenate([out["global"][None], out["part"]], axis=0)
    np.testing.assert_allclose(np.asarray(got), np.asarray(ref),
                               rtol=1e-3, atol=1e-3)

    print("KERNEL_OK")
</pallas_src>

<mosaic_0001>
module attributes {stable_mosaic.version = 11 : i64} {
  func.func @_matmul_bias_kernel(%arg0: i32, %arg1: i32, %arg2: i32, %arg3: memref<64x512xbf16, #tpu.memory_space<vmem>>, %arg4: memref<512x128xbf16, #tpu.memory_space<vmem>>, %arg5: memref<1x128xf32, #tpu.memory_space<vmem>>, %arg6: memref<64x128xf32, #tpu.memory_space<vmem>>, %arg7: memref<64x128xf32, #tpu.memory_space<vmem>>) attributes {dimension_semantics = [#tpu.dimension_semantics<parallel>, #tpu.dimension_semantics<parallel>, #tpu.dimension_semantics<arbitrary>], iteration_bounds = array<i64: 1, 2, 6>, scalar_prefetch = 0 : i64, scratch_operands = 1 : i64, tpu.core_type = #tpu.core_type<tc>, window_params = [{transform_indices = @transform_0, window_bounds = array<i64: 64, 512>}, {transform_indices = @transform_1, window_bounds = array<i64: 512, 128>}, {transform_indices = @transform_2, window_bounds = array<i64: 1, 128>}, {transform_indices = @transform_3, window_bounds = array<i64: 64, 128>}]} {
    %c0_i32 = arith.constant 0 : i32
    %0 = arith.cmpi eq, %arg2, %c0_i32 : i32
    %1 = arith.extui %0 : i1 to i32
    %c0_i32_0 = arith.constant 0 : i32
    %2 = arith.cmpi ne, %1, %c0_i32_0 : i32
    scf.if %2 {
      %cst_9 = arith.constant 0.000000e+00 : f32
      %12 = vector.broadcast %cst_9 : f32 to vector<64x128xf32>
      %c0_10 = arith.constant 0 : index
      %c0_11 = arith.constant 0 : index
      %13 = vector.load %arg7[%c0_10, %c0_11] : memref<64x128xf32, #tpu.memory_space<vmem>>, vector<64x128xf32>
      tpu.vector_store %arg7[%c0_10, %c0_11], %12 {strides = array<i32>} : memref<64x128xf32, #tpu.memory_space<vmem>>, vector<64x128xf32>,
    } else {
    }
    %c0 = arith.constant 0 : index
    %c0_1 = arith.constant 0 : index
    %3 = vector.load %arg7[%c0, %c0_1] : memref<64x128xf32, #tpu.memory_space<vmem>>, vector<64x128xf32>
    %c0_2 = arith.constant 0 : index
    %c0_3 = arith.constant 0 : index
    %4 = vector.load %arg3[%c0_2, %c0_3] : memref<64x512xbf16, #tpu.memory_space<vmem>>, vector<64x512xbf16>
    %c0_4 = arith.constant 0 : index
    %c0_5 = arith.constant 0 : index
    %5 = vector.load %arg4[%c0_4, %c0_5] : memref<512x128xbf16, #tpu.memory_space<vmem>>, vector<512x128xbf16>
    %cst = arith.constant dense<0.000000e+00> : vector<64x128xf32>
    %6 = tpu.matmul %4, %5, %cst {dimension_numbers = #tpu.dot_dimension_numbers<[1], [0], [0], [1], [0, 0, 1, 1], [], []>} : vector<64x512xbf16>, vector<512x128xbf16>, vector<64x128xf32> -> vector<64x128xf32>
    %7 = arith.addf %3, %6 : vector<64x128xf32>
    %c0_6 = arith.constant 0 : index
    %c0_7 = arith.constant 0 : index
    %8 = vector.load %arg7[%c0_6, %c0_7] : memref<64x128xf32, #tpu.memory_space<vmem>>, vector<64x128xf32>
    tpu.vector_store %arg7[%c0_6, %c0_7], %7 {strides = array<i32>} : memref<64x128xf32, #tpu.memory_space<vmem>>, vector<64x128xf32>,
    %c5_i32 = arith.constant 5 : i32
    %9 = arith.cmpi eq, %arg2, %c5_i32 : i32
    %10 = arith.extui %9 : i1 to i32
    %c0_i32_8 = arith.constant 0 : i32
    %11 = arith.cmpi ne, %10, %c0_i32_8 : i32
    scf.if %11 {
      %c0_9 = arith.constant 0 : index
      %c0_10 = arith.constant 0 : index
      %12 = vector.load %arg7[%c0_9, %c0_10] : memref<64x128xf32, #tpu.memory_space<vmem>>, vector<64x128xf32>
      %c0_11 = arith.constant 0 : index
      %c0_12 = arith.constant 0 : index
      %13 = vector.load %arg5[%c0_11, %c0_12] : memref<1x128xf32, #tpu.memory_space<vmem>>, vector<1x128xf32>
      %14 = vector.broadcast %13 : vector<1x128xf32> to vector<64x128xf32>
      %15 = arith.addf %12, %14 : vector<64x128xf32>
      %c0_13 = arith.constant 0 : index
      %c0_14 = arith.constant 0 : index
      %16 = vector.load %arg6[%c0_13, %c0_14] : memref<64x128xf32, #tpu.memory_space<vmem>>, vector<64x128xf32>
      tpu.vector_store %arg6[%c0_13, %c0_14], %15 {strides = array<i32>} : memref<64x128xf32, #tpu.memory_space<vmem>>, vector<64x128xf32>,
    } else {
    }
    return
  }
  func.func @transform_0(%arg0: i32, %arg1: i32, %arg2: i32) -> (i32, i32) {
    %c0_i32 = arith.constant 0 : i32
    return %arg0, %arg2 : i32, i32
  }
  func.func @transform_1(%arg0: i32, %arg1: i32, %arg2: i32) -> (i32, i32) {
    %c0_i32 = arith.constant 0 : i32
    return %arg2, %arg1 : i32, i32
  }
  func.func @transform_2(%arg0: i32, %arg1: i32, %arg2: i32) -> (i32, i32) {
    %c0_i32 = arith.constant 0 : i32
    %c0_i32_0 = arith.constant 0 : i32
    return %c0_i32, %arg1 : i32, i32
  }
  func.func @transform_3(%arg0: i32, %arg1: i32, %arg2: i32) -> (i32, i32) {
    %c0_i32 = arith.constant 0 : i32
    return %arg0, %arg1 : i32, i32
  }
}

</mosaic_0001>

<bundles_post_ra>
// kernel: tpu_custom_call.1
= control target key start
LH: loop header
LB: loop body
LE: loop exit
PB: predicated region body
PF: predicated region fallthrough
CT: control target
= control target key end

     0   :  { %s2047_s0 = inlined_call_operand.hbm [shape: bf16[64,3072], index: 0, kind: input, shape index: {}]   ;;  %s2048_s1 = inlined_call_operand.hbm [shape: bf16[3072,256], index: 1, kind: input, shape index: {}]   ;;  %s2049_s2 = inlined_call_operand.hbm [shape: f32[1,256], index: 2, kind: input, shape index: {}]   ;;  %s2050_s3 = inlined_call_operand.hbm [shape: f32[64,256], index: 3, kind: output, shape index: {}]  }
   0x1   :  { %2059 = sst [smem:[#allocation21_spill]] %s2047_s0 }
   0x2   :  { %2060 = sst [smem:[#allocation22_spill]] %s2048_s1 }
   0x3   :  { %2061 = sst [smem:[#allocation23_spill]] %s2050_s3 }
   0x4   :  { %8 = vsyncpa [#allocation4], 0 }
   0x5   :  { %10 = vsyncpa [#allocation4 + $0x1], 0 }
   0x6   :  { %11 = vsyncpa [#allocation7], 0 }
   0x7   :  { %13 = vsyncpa [#allocation7 + $0x1], 0 }
   0x8   :  { %14 = vsyncpa [#allocation5], 0 }
   0x9   :  { %16 = vsyncpa [#allocation5 + $0x1], 0  ;;  %s1625_s12 = smov 0   ;;  %s1627_s13 = smov 0  }
   0xa   :  { %s1629_s14 = smov 0   ;;  %s1631_s15 = smov 0  }
   0xb   :  { %s1633_s16 = smov 0   ;;  %s1635_s17 = smov 0  }
   0xc   :  { %s1637_s18 = smov 0   ;;  %s1639_s19 = smov 0  }
   0xd   :  { %s1641_s20 = smov 0   ;;  %s1643_s21 = smov 0  }
   0xe   :  { %s1645_s22 = smov 0   ;;  %s1647_s23 = smov 0  }
   0xf   :  { %s1649_s24 = smov 0   ;;  %s1651_s25 = smov 0  }
  0x10 LB: > { %2062 = sst [smem:[#allocation14_spill]] %s1573_s21  ;;  %s34_s26 = sadd.s32 1, %s1581_s23  ;;  %s1589_s25 = sphi %s1651_s25, %s22_s25   ;;  %s1585_s24 = sphi %s1649_s24, %s2099_s24   ;;  %s1581_s23 = sphi %s1647_s23, %s2098_s23   ;;  %s1577_s22 = sphi %s1645_s22, %s2097_s22   ;;  %s1573_s21 = sphi %s1643_s21, %s2096_s21   ;;  %s1569_s20 = sphi %s1641_s20, %s2108_s20   ;;  %s1565_s19 = sphi %s1639_s19, %s2107_s19   ;;  %s1561_s18 = sphi %s1637_s18, %s2106_s18   ;;  %s1557_s17 = sphi %s1635_s17, %s2105_s17   ;;  %s1553_s16 = sphi %s1633_s16, %s2104_s16   ;;  %s1549_s15 = sphi %s1631_s15, %s2103_s15   ;;  %s1545_s14 = sphi %s1629_s14, %s2102_s14   ;;  %s1541_s13 = sphi %s1627_s13, %s2101_s13   ;;  %s1537_s12 = sphi %s1625_s12, %s2100_s12  }
  0x11   : > { %2063 = sst [smem:[#allocation15_spill]] %s1577_s22  ;;  %p1697_p0 = scmp.ge.s32.totalorder %s34_s26, 6 }
  0x12   : > { %2064 = sst [smem:[#allocation16_spill]] %s1581_s23  ;;  %p58_p1 = scmp.eq.s32.totalorder %s1589_s25, 0 }
  0x13   : > { %2065 = sst [smem:[#allocation17_spill]] %s1585_s24  ;;  %p85_p2 = scmp.ne.s32.totalorder %s1557_s17, %s1553_s16 }
  0x14   : > { %s2110_s26 = smov (%p1697_p0, %s34_s26), 0  ;;  %p91_p4 = scmp.ne.s32.totalorder %s1553_s16, %s1549_s15 }
  0x15   : > { %2067 = sst [smem:[#allocation18_spill]] %s2110_s26  ;;  %p1711_p3 = por %p85_p2, %p58_p1 }
  0x16   : > { %s1719_s4 = ssub.s32 %s1581_s23, %s2110_s26  ;;  %p2054_p6 = scmp.lt.s32.totalorder %s1589_s25, 12 }
  0x17   : > { %p48_p5 = scmp.eq.s32.totalorder %s1719_s4, 0  ;;  %s193_s5 = sand.u32 1, %s1589_s25  }
  0x18   : > { %s195_s6 = sand.u32 1, %s1557_s17   ;;  %s1070_s8 = sshll.u32 %s1581_s23, 7 }
  0x19   : > { %s1005_s7 = sshll.u32 %s195_s6, 8  ;;  %s203_s9 = sadd.s32 %s1585_s24, %s1070_s8 }
  0x1a   : > { %s197_s10 = scalar_lea.vmem [#allocation6], %s1005_s7  ;;  %s1008_s29 = sshll.u32 %s203_s9, 6 }
  0x1b   : > { %s206_s11 = sshll.u32 %s197_s10, 4  ;;  %s2069_s1 = sld [smem:[#allocation22_spill]]  ;;  %s207_s11 = int_to_ptr.vmem [resolvable:$true] %s206_s11 }
  0x1c   : > { %p1734_p7 = pnand %p2054_p6, %p1711_p3  ;;  %s1738_s21 = scalar_lea.sflag [#allocation7], %s193_s5 }
  0x1d   : > { %s1366_s6 = scalar_lea.vmem %s207_s11, 4096  ;;  %s1591_s7 = smov [#allocation6]  }
  0x1e   : > { %p1355_p8 = pneg %p1734_p7  ;;  %p1367_p9 = scmp.ne.s32.totalorder %s207_s11, %s1366_s6 }
  0x1f   : > { %s1371_s8 = sshll.u32 %s1591_s7, 4  ;;  %s1372_s8 = int_to_ptr.vmem [resolvable:$false] %s1371_s8 }
  0x20   : > { %p1369_p10 = pnand %p1367_p9, %p1355_p8  ;;  %s1373_s3 = scalar_lea.vmem %s1372_s8, 8192 }
  0x21   : > { %s205_s22 = scalar_lea.hbm %s2069_s1, %s1008_s29  ;;  %p1374_p12 = scmp.lt.s32.totalorder %s207_s11, %s1372_s8 }
  0x22   : > { %p1370_p11 = pneg %p1369_p10  ;;  %p1375_p13 = scmp.lt.s32.totalorder %s1373_s3, %s1366_s6 }
  0x24   : > { %p1376_p2 = por %p1375_p13, %p1374_p12 }
  0x26   : > { %p1377_p3 = pnand %p1376_p2, %p1370_p11 }
  0x28   : > { %1380 = shalt.err (!%p1377_p3)
}
  0x29   : > { %s1592_s27 = smov 128   ;;  %s1593_s29 = smov 64  }
  0x2a   : > { %s1594_s30 = smov 4   ;;  %p1010_p8 = scmp.ge.s32.totalorder %s1589_s25, 1 }
  0x2b   : > { %1165 = dma.hbm_to_vmem [thread:$0]  (!%p1734_p7), %s205_s22, 4096, %s207_s11, %s1738_s21, %s1592_s27, %s1593_s29, %s1594_s30  }
  0x2c   : > { %p231_p9 = scmp.lt.s32.totalorder %s1589_s25, 13  ;;  %s50_s9 = sadd.s32 1, %s1569_s20 }
  0x2d   : > { %s1755_s10 = scalar_select %p48_p5, %s1569_s20, %s50_s9  }
  0x2e   : > { %p1747_p10 = pnand %p1010_p8, %p231_p9  ;;  %p57_p11 = scmp.ne.s32.totalorder %s1569_s20, %s1565_s19 }
  0x2f   : > { %2072 = sst [smem:[#allocation19_spill]] %s1755_s10  ;;  %p63_p12 = scmp.ne.s32.totalorder %s1565_s19, %s1561_s18 }
  0x30   : > { %s169_s6 = sand.u32 1, %s1569_s20   ;;  %s1069_s7 = sshll.u32 %s1581_s23, 8 }
  0x31   : > { %p59_p13 = por %p58_p1, %p57_p11  ;;  %s1002_s8 = sshll.u32 %s169_s6, 7 }
  0x32   : > { %s2073_s0 = sld [smem:[#allocation21_spill]]  ;;  %s173_s27 = scalar_lea.vmem [#allocation3], %s1002_s8 }
  0x33   : > { %p1770_p7 = pnand %p2054_p6, %p59_p13  ;;  %s183_s29 = sshll.u32 %s173_s27, 4  ;;  %s184_s29 = int_to_ptr.vmem [resolvable:$true] %s183_s29 }
  0x34   : > { %s170_s30 = scalar_lea.sflag [#allocation4], %s169_s6  ;;  %s1394_s9 = scalar_lea.vmem %s184_s29, 2048 }
  0x35   : > { %p1383_p5 = pneg %p1770_p7  ;;  %p1395_p2 = scmp.ne.s32.totalorder %s184_s29, %s1394_s9 }
  0x36   : > { %s1595_s1 = smov [#allocation3]  }
  0x37   : > { %p1397_p3 = pnand %p1395_p2, %p1383_p5  ;;  %s1399_s23 = sshll.u32 %s1595_s1, 4  ;;  %s1400_s23 = int_to_ptr.vmem [resolvable:$false] %s1399_s23 }
  0x38   : > { %s182_s22 = scalar_lea.hbm %s2073_s0, %s1069_s7  ;;  %s1401_s7 = scalar_lea.vmem %s1400_s23, 4096 }
  0x39   : > { %p1398_p8 = pneg %p1397_p3  ;;  %p1402_p9 = scmp.lt.s32.totalorder %s184_s29, %s1400_s23 }
  0x3a   : > { %p1403_p11 = scmp.lt.s32.totalorder %s1401_s7, %s1394_s9 }
  0x3c   : > { %p1404_p13 = por %p1403_p11, %p1402_p9 }
  0x3e   : > { %p1405_p6 = pnand %p1404_p13, %p1398_p8 }
  0x40   : > { %1408 = shalt.err (!%p1405_p6)
}
  0x41   : > { %s1596_s3 = smov 1536   ;;  %s1597_s1 = smov 256  }
  0x42   : > { %s1598_s23 = smov 16   ;;  %s1779_s6 = sadd.s32 4294967295, %s1589_s25  }
  0x43   : > { %1162 = dma.hbm_to_vmem [thread:$0]  (!%p1770_p7), %s182_s22, 2048, %s184_s29, %s170_s30, %s1596_s3, %s1597_s1, %s1598_s23  }
  0x44   : > { %s999_s8 = sadd.s32 4294967294, %s1589_s25   ;;  %s2075_s26 = sadd.s32 1, %s1585_s24 }
  0x45   : > { %s2112_s26 = smov (!%p1697_p0, %s2075_s26), %s1585_s24  ;;  %p64_p6 = scmp.eq.s32.totalorder %s1779_s6, 0 }
  0x46   : > { %s104_s11 = sadd.s32 1, %s1545_s14  ;;  %p39_p7 = scmp.ge.s32.totalorder %s2112_s26, 2 }
  0x47   : > { %p111_p5 = scmp.ne.s32.totalorder %s1545_s14, %s1541_s13  ;;  %p1796_p2 = por %p64_p6, %p63_p12 }
  0x48   : > { %p1805_p0 = por %p91_p4, %p64_p6  ;;  %s2114_s26 = smov (%p39_p7, %s2112_s26), 0 }
  0x49   : > { %2078 = sst [smem:[#allocation20_spill]] %s2114_s26  ;;  %p1816_p3 = por %p111_p5, %p58_p1 }
  0x4a   : > { %p117_p12 = scmp.ne.s32.totalorder %s1541_s13, %s1537_s12  ;;  %s74_s27 = ssub.s32 %s1585_s24, %s2114_s26 }
  0x4b   : > { %p143_p8 = scmp.eq.s32.totalorder %s1779_s6, 11  ;;  %s75_s15 = sor.u32 %s74_s27, %s1719_s4 }
  0x4c   : > { %p102_p4 = scmp.eq.s32.totalorder %s74_s27, 0  ;;  %p76_p9 = scmp.eq.s32.totalorder %s75_s15, 0 }
  0x4d   : > { %p1831_p11 = por %p117_p12, %p64_p6  ;;  %s2081_s9 = sadd.s32 1, %s1557_s17 }
  0x4e   : > { %s1836_s30 = scalar_select %p102_p4, %s1545_s14, %s104_s11  }
  0x4f   : > { %s2080_s29 = scalar_select %p1831_p11, 1, 0 }
  0x50   : > { %s1841_s7 = scalar_select %p76_p9, %s1557_s17, %s2081_s9  }
  0x51   : > { %p1846_p1 = por %p143_p8, %p111_p5  ;;  %p149_p13 = scmp.eq.s32.totalorder %s999_s8, 11 }
  0x52   : > { %s218_s4 = sand.u32 1, %s1545_s14   ;;  %s1009_s1 = sshll.u32 %s1585_s24, 4 }
  0x53   : > { %s2082_s3 = scalar_select %p1846_p1, 1, 0 }
  0x54   : > { %p1855_p7 = por %p149_p13, %p117_p12  ;;  %s224_s11 = scalar_lea.hbm %s2049_s2, %s1009_s1 }
  0x55   : > { %s219_s0 = scalar_lea.vmem [#allocation8], %s218_s4  ;;  %p2084_p6 = scmp.lt.s32.totalorder %s1589_s25, 12 }
  0x56   : > { %s2083_s23 = scalar_select %p1855_p7, 1, 0 }
  0x57   : > { %s226_s9 = sshll.u32 %s219_s0, 4  ;;  %p1866_p5 = pnand %p2084_p6, %p1816_p3  ;;  %s227_s9 = int_to_ptr.vmem [resolvable:$true] %s226_s9 }
  0x58   : > { %s1422_s8 = scalar_lea.vmem %s227_s9, 16  ;;  %s1599_s24 = smov [#allocation8]  }
  0x59   : > { %p1411_p8 = pneg %p1866_p5  ;;  %p1423_p12 = scmp.ne.s32.totalorder %s227_s9, %s1422_s8 }
  0x5a   : > { %s1427_s10 = sshll.u32 %s1599_s24, 4  ;;  %s1428_s10 = int_to_ptr.vmem [resolvable:$false] %s1427_s10 }
  0x5b   : > { %p1425_p4 = pnand %p1423_p12, %p1411_p8  ;;  %s1429_s1 = scalar_lea.vmem %s1428_s10, 32 }
  0x5c   : > { %p1430_p13 = scmp.lt.s32.totalorder %s227_s9, %s1428_s10  ;;  %p1431_p7 = scmp.lt.s32.totalorder %s1429_s1, %s1422_s8 }
  0x5d   : > { %p1426_p9 = pneg %p1425_p4 }
  0x5e   : > { %p1432_p1 = por %p1431_p7, %p1430_p13 }
  0x60   : > { %p1433_p11 = pnand %p1432_p1, %p1426_p9 }
  0x62   : > { %1436 = shalt.err (!%p1433_p11)
}
  0x63   : > { %1168 = dma.hbm_to_vmem [thread:$0]  (!%p1866_p5), %s224_s11, 16, %s227_s9, %s1738_s21  }
  0x64   : > { %235 = sbr.rel (%p1747_p10) target bundleno = 434 (0x1b2), region = 32  ;;  %s237_s0 = sand.u32 (!%p1747_p10), 1, %s1565_s19  }
  0x65   : > { %s1011_s18 = sshll.u32 (!%p1747_p10), %s237_s0, 7  ;;  %s238_s4 = scalar_lea.sflag (!%p1747_p10), [#allocation4], %s237_s0 }
  0x66   : > { %s1878_s24 = scalar_lea.vmem (!%p1747_p10), [#allocation3], %s1011_s18 }
  0x69   : > { %1520 = dma.done.wait (%p1796_p2), %s238_s4, 2048  }
  0x6a   : > { %1522 = vsyncadd (%p1796_p2), %s238_s4, 4294965248  ;;  %s246_s10 = sand.u32 1, %s1779_s6   ;;  %s248_s21 = sand.u32 1, %s1553_s16  }
  0x6b   : > { %s1012_s26 = sshll.u32 %s248_s21, 8  ;;  %s247_s5 = scalar_lea.sflag [#allocation7], %s246_s10 }
  0x6c   : > { %s1886_s27 = scalar_lea.vmem [#allocation6], %s1012_s26 }
  0x6d   : > { %1524 = dma.done.wait (%p1805_p0), %s247_s5, 4096  }
  0x6e   : > { %1526 = vsyncadd (%p1805_p0), %s247_s5, 4294963200  ;;  %s1893_s15 = sand.u32 1, %s1541_s13   ;;  %p2086_p10 = scmp.ne.s32.totalorder %s2080_s29, 0 }
  0x6f   : > { %s258_s22 = scalar_lea.vmem [#allocation8], %s1893_s15 }
  0x70   : > { %1528 = dma.done.wait (%p2086_p10), %s247_s5, 16  }
  0x71   : > { %1530 = vsyncadd (%p2086_p10), %s247_s5, 4294967280  ;;  %s1013_s6 = sshll.u32 %s1893_s15, 6  ;;  %s2087_s9 = sld [smem:[#allocation14_spill]] }
  0x72   : > { %s1901_s11 = scalar_lea.vmem [#allocation9], %s1013_s6 }
  0x77   : > { %p1014_p2 = scmp.ne.s32.totalorder %s2087_s9, 0 }
  0x79   : > { %298 = sbr.rel (%p1014_p2) target bundleno = 131 (0x83), region = 48 }
  0x7e   : > { %v1600_v0 = vmov 0.0  }
  0x7f   : > { %299 = vst [vmem:[#allocation2 + $0x30] sm:$0xff] %v1600_v0  ;;  %300 = vst [vmem:[#allocation2] sm:$0xff] %v1600_v0 }
  0x80   : > { %301 = vst [vmem:[#allocation2 + $0x18] sm:$0xff] %v1600_v0  ;;  %302 = vst [vmem:[#allocation2 + $0x10] sm:$0xff] %v1600_v0 }
  0x81   : > { %303 = vst [vmem:[#allocation2 + $0x8] sm:$0xff] %v1600_v0  ;;  %304 = vst [vmem:[#allocation2 + $0x20] sm:$0xff] %v1600_v0 }
  0x82   : > { %305 = vst [vmem:[#allocation2 + $0x28] sm:$0xff] %v1600_v0  ;;  %306 = vst [vmem:[#allocation2 + $0x38] sm:$0xff] %v1600_v0 }
  0x83 PF: > { %v1297_v1 = vld [vmem:[%s1886_s27 + $0x78] sm:$0xff]   ;;  %v1301_v5 = vld [vmem:[%s1886_s27 + $0x70] sm:$0xff]   ;;  %v1305_v9 = vld [vmem:[%s1886_s27 + $0x68] sm:$0xff]   ;;  %s2088_s28 = sld [smem:[#allocation14_spill]] }
  0x84   : > { %v1298_v2 = vld [vmem:[%s1886_s27 + $0xf8] sm:$0xff]   ;;  %1071 = vmatprep.subr.bf16.mxu0 %v1297_v1  ;;  %v1302_v6 = vld [vmem:[%s1886_s27 + $0xf0] sm:$0xff]   ;;  %v1306_v10 = vld [vmem:[%s1886_s27 + $0xe8] sm:$0xff]  }
  0x85   : > { %v1299_v3 = vld [vmem:[%s1886_s27 + $0x38] sm:$0xff]   ;;  %1111 = vmatprep.subr.bf16.mxu1 %v1298_v2  ;;  %v1303_v7 = vld [vmem:[%s1886_s27 + $0x30] sm:$0xff]   ;;  %v1307_v11 = vld [vmem:[%s1886_s27 + $0x28] sm:$0xff]  }
  0x86   : > { %v1300_v4 = vld [vmem:[%s1886_s27 + $0xb8] sm:$0xff]   ;;  %1072 = vmatpush3.bf16.msra.mxu0 %v1299_v3  ;;  %v1304_v8 = vld [vmem:[%s1886_s27 + $0xb0] sm:$0xff]   ;;  %v1308_v12 = vld [vmem:[%s1886_s27 + $0xa8] sm:$0xff]  }
  0x87   : > { %1112 = vmatpush3.bf16.msra.mxu1 %v1300_v4  ;;  %1073 = vmatprep.subr.bf16.mxu0 %v1301_v5  ;;  %v1309_v13 = vld [vmem:[%s1886_s27 + $0x60] sm:$0xff]   ;;  %v1313_v17 = vld [vmem:[%s1886_s27 + $0x58] sm:$0xff]   ;;  %v1317_v21 = vld [vmem:[%s1886_s27 + $0x50] sm:$0xff]  }
  0x88   : > { %1113 = vmatprep.subr.bf16.mxu1 %v1302_v6  ;;  %v1310_v14 = vld [vmem:[%s1886_s27 + $0xe0] sm:$0xff]   ;;  %v1314_v18 = vld [vmem:[%s1886_s27 + $0xd8] sm:$0xff]   ;;  %v1318_v22 = vld [vmem:[%s1886_s27 + $0xd0] sm:$0xff]  }
  0x89   : > { %v1311_v15 = vld [vmem:[%s1886_s27 + $0x20] sm:$0xff]   ;;  %v1315_v19 = vld [vmem:[%s1886_s27 + $0x18] sm:$0xff]   ;;  %v1319_v23 = vld [vmem:[%s1886_s27 + $0x10] sm:$0xff]   ;;  %p1063_p0 = scmp.ne.s32.totalorder %s2088_s28, 5 }
  0x8a   : > { %1074 = vmatpush3.bf16.msra.mxu0 %v1303_v7  ;;  %v1312_v16 = vld [vmem:[%s1886_s27 + $0xa0] sm:$0xff]   ;;  %v1316_v20 = vld [vmem:[%s1886_s27 + $0x98] sm:$0xff]   ;;  %v1320_v24 = vld [vmem:[%s1886_s27 + $0x90] sm:$0xff]  }
  0x8b   : > { %1114 = vmatpush3.bf16.msra.mxu1 %v1304_v8  ;;  %1075 = vmatprep.subr.bf16.mxu0 %v1305_v9  ;;  %v1321_v25 = vld [vmem:[%s1886_s27 + $0x48] sm:$0xff]   ;;  %v1325_v29 = vld [vmem:[%s1886_s27 + $0x40] sm:$0xff]   ;;  %v307_v56 = vld [vmem:[#allocation2 + $0x30] sm:$0xff] }
  0x8c   : > { %1115 = vmatprep.subr.bf16.mxu1 %v1306_v10  ;;  %v1322_v26 = vld [vmem:[%s1886_s27 + $0xc8] sm:$0xff]   ;;  %v1326_v30 = vld [vmem:[%s1886_s27 + $0xc0] sm:$0xff]   ;;  %v309_v10 = vld [vmem:[#allocation2 + $0x18] sm:$0xff] }
  0x8d   : > { %v1323_v27 = vld [vmem:[%s1886_s27 + $0x8] sm:$0xff]   ;;  %v1327_v31 = vld [vmem:[%s1886_s27] sm:$0xff]  }
  0x8e   : > { %1076 = vmatpush3.bf16.msra.mxu0 %v1307_v11  ;;  %v1324_v28 = vld [vmem:[%s1886_s27 + $0x88] sm:$0xff]   ;;  %v1328_v32 = vld [vmem:[%s1886_s27 + $0x80] sm:$0xff]  }
  0x8f   : > { %1116 = vmatpush3.bf16.msra.mxu1 %v1308_v12  ;;  %1077 = vmatprep.subr.bf16.mxu0 %v1309_v13  ;;  %v1329_v33 = vld [vmem:[%s1878_s24] ss:$16 sps:$4 sm:$0xff]   ;;  %v1331_v34 = vld [vmem:[%s1878_s24 + $0x4] ss:$16 sps:$4 sm:$0xff]   ;;  %v1332_v35 = vld [vmem:[%s1878_s24 + $0x8] ss:$16 sps:$4 sm:$0xff]  }
  0x90   : > { %1117 = vmatprep.subr.bf16.mxu1 %v1310_v14  ;;  %v1334_v36 = vld [vmem:[%s1878_s24 + $0xc] ss:$16 sps:$4 sm:$0xff]   ;;  %699 = vmatprep.mubr.bf16.mxu0 %v1331_v34  ;;  %v1335_v37 = vld [vmem:[%s1878_s24 + $0x24] ss:$16 sps:$4 sm:$0xff]   ;;  %v1339_v39 = vld [vmem:[%s1878_s24 + $0x20] ss:$16 sps:$4 sm:$0xff]  }
  0x91   : > { %764 = vmatprep.mubr.bf16.mxu1 %v1334_v36  ;;  %v1337_v38 = vld [vmem:[%s1878_s24 + $0x2c] ss:$16 sps:$4 sm:$0xff]   ;;  %v1340_v40 = vld [vmem:[%s1878_s24 + $0x28] ss:$16 sps:$4 sm:$0xff]   ;;  %v1341_v41 = vld [vmem:[%s1878_s24 + $0x44] ss:$16 sps:$4 sm:$0xff]  }
  0x92   : > { %1078 = vmatpush3.bf16.msra.mxu0 %v1311_v15  ;;  %v1343_v42 = vld [vmem:[%s1878_s24 + $0x4c] ss:$16 sps:$4 sm:$0xff]   ;;  %v1345_v43 = vld [vmem:[%s1878_s24 + $0x40] ss:$16 sps:$4 sm:$0xff]   ;;  %v1346_v44 = vld [vmem:[%s1878_s24 + $0x48] ss:$16 sps:$4 sm:$0xff]  }
  0x93   : > { %1118 = vmatpush3.bf16.msra.mxu1 %v1312_v16  ;;  %1079 = vmatprep.subr.bf16.mxu0 %v1313_v17  ;;  %v1347_v45 = vld [vmem:[%s1878_s24 + $0x64] ss:$16 sps:$4 sm:$0xff]   ;;  %v1349_v46 = vld [vmem:[%s1878_s24 + $0x6c] ss:$16 sps:$4 sm:$0xff]   ;;  %v1351_v47 = vld [vmem:[%s1878_s24 + $0x60] ss:$16 sps:$4 sm:$0xff]  }
  0x94   : > { %1119 = vmatprep.subr.bf16.mxu1 %v1314_v18  ;;  %v1352_v48 = vld [vmem:[%s1878_s24 + $0x68] ss:$16 sps:$4 sm:$0xff]   ;;  %v308_v1 = vld [vmem:[#allocation2] sm:$0xff] }
  0x96   : > { %1080 = vmatpush3.bf16.msra.mxu0 %v1315_v19  ;;  %v310_v19 = vld [vmem:[#allocation2 + $0x10] sm:$0xff] }
  0x97   : > { %1120 = vmatpush3.bf16.msra.mxu1 %v1316_v20  ;;  %1081 = vmatprep.subr.bf16.mxu0 %v1317_v21 }
  0x98   : > { %1121 = vmatprep.subr.bf16.mxu1 %v1318_v22 }
  0x9a   : > { %1082 = vmatpush3.bf16.msra.mxu0 %v1319_v23 }
  0x9b   : > { %1122 = vmatpush3.bf16.msra.mxu1 %v1320_v24  ;;  %1083 = vmatprep.subr.bf16.mxu0 %v1321_v25 }
  0x9c   : > { %1123 = vmatprep.subr.bf16.mxu1 %v1322_v26 }
  0x9e   : > { %1084 = vmatpush3.bf16.msra.mxu0 %v1323_v27 }
  0x9f   : > { %1124 = vmatpush3.bf16.msra.mxu1 %v1324_v28  ;;  %1085 = vmatprep.subr.bf16.mxu0 %v1325_v29  ;;  %v311_v28 = vld [vmem:[#allocation2 + $0x8] sm:$0xff] }
  0xa0   : > { %1125 = vmatprep.subr.bf16.mxu1 %v1326_v30 }
  0xa2   : > { %1086 = vmatpush3.bf16.msra.mxu0 %v1327_v31 }
  0xa3   : > { %1126 = vmatpush3.bf16.msra.mxu1 %v1328_v32 }
  0xa5   : > { %700 = vmatmul.mubr.bf16.vlgmr.msra.gmra.mxu0 %v1329_v33 }
  0xa6   : > { %765 = vmatmul.mubr.bf16.vlgmr.msra.gmra.mxu1 %v1332_v35  ;;  %707 = vmatprep.mubr.bf16.mxu0 %v1335_v37  ;;  %v312_v37 = vld [vmem:[#allocation2 + $0x20] sm:$0xff] }
  0xa7   : > { %772 = vmatprep.mubr.bf16.mxu1 %v1337_v38 }
  0xad   : > { %708 = vmatmul.mubr.bf16.gmra.mxu0 %v1339_v39 }
  0xae   : > { %773 = vmatmul.mubr.bf16.gmra.mxu1 %v1340_v40  ;;  %715 = vmatprep.mubr.bf16.mxu0 %v1341_v41 }
  0xaf   : > { %780 = vmatprep.mubr.bf16.mxu1 %v1343_v42 }
  0xb5   : > { %716 = vmatmul.mubr.bf16.gmra.mxu0 %v1345_v43 }
  0xb6   : > { %781 = vmatmul.mubr.bf16.gmra.mxu1 %v1346_v44  ;;  %723 = vmatprep.mubr.bf16.mxu0 %v1347_v45 }
  0xb7   : > { %788 = vmatprep.mubr.bf16.mxu1 %v1349_v46  ;;  %v313_v46 = vld [vmem:[#allocation2 + $0x28] sm:$0xff] }
  0xbd   : > { %724 = vmatmul.mubr.bf16.gmra.mxu0 %v1351_v47 }
  0xbe   : > { %789 = vmatmul.mubr.bf16.gmra.mxu1 %v1352_v48 }
 0x165   : > { %v1087_v49 = vpop.f32.mrf.mxu0 }
 0x166   : > { %v1127_v50 = vpop.f32.mrf.mxu1 }
 0x167   : > { %v1088_v51 = vpop.f32.mrf.mxu0 }
 0x168   : > { %v1089_v52 = vadd.f32 %v1088_v51, %v1087_v49  ;;  %v1128_v53 = vpop.f32.mrf.mxu1 }
 0x169   : > { %v1129_v54 = vadd.f32 %v1128_v53, %v1127_v50  ;;  %v1090_v55 = vpop.f32.mrf.mxu0 }
 0x16a   : > { %v1130_v57 = vpop.f32.mrf.mxu1 }
 0x16b   : > { %v767_v58 = vadd.f32 %v1129_v54, %v1089_v52  ;;  %v1091_v59 = vpop.f32.mrf.mxu0  ;;  %v314_v54 = vld [vmem:[#allocation2 + $0x38] sm:$0xff] }
 0x16c   : > { %v1092_v60 = vadd.f32 %v1091_v59, %v1090_v55  ;;  %v1131_v61 = vpop.f32.mrf.mxu1 }
 0x16d   : > { %v797_v62 = vadd.f32 %v767_v58, %v307_v56  ;;  %v1132_v63 = vadd.f32 %v1131_v61, %v1130_v57  ;;  %v1093_v0 = vpop.f32.mrf.mxu0 }
 0x16e   : > { %v1133_v2 = vpop.f32.mrf.mxu1 }
 0x16f   : > { %805 = vst [vmem:[#allocation2 + $0x30] sm:$0xff] %v797_v62  ;;  %v770_v3 = vadd.f32 %v1132_v63, %v1092_v60  ;;  %v1094_v4 = vpop.f32.mrf.mxu0 }
 0x170   : > { %v1095_v5 = vadd.f32 %v1094_v4, %v1093_v0  ;;  %v1134_v6 = vpop.f32.mrf.mxu1 }
 0x171   : > { %v798_v7 = vadd.f32 %v770_v3, %v308_v1  ;;  %v1135_v8 = vadd.f32 %v1134_v6, %v1133_v2  ;;  %v1096_v9 = vpop.f32.mrf.mxu0 }
 0x172   : > { %v1136_v11 = vpop.f32.mrf.mxu1 }
 0x173   : > { %806 = vst [vmem:[#allocation2] sm:$0xff] %v798_v7  ;;  %v775_v12 = vadd.f32 %v1135_v8, %v1095_v5  ;;  %v1097_v13 = vpop.f32.mrf.mxu0 }
 0x174   : > { %v1098_v14 = vadd.f32 %v1097_v13, %v1096_v9  ;;  %v1137_v15 = vpop.f32.mrf.mxu1 }
 0x175   : > { %v799_v16 = vadd.f32 %v775_v12, %v309_v10  ;;  %v1138_v17 = vadd.f32 %v1137_v15, %v1136_v11  ;;  %v1099_v18 = vpop.f32.mrf.mxu0 }
 0x176   : > { %v1139_v20 = vpop.f32.mrf.mxu1 }
 0x177   : > { %807 = vst [vmem:[#allocation2 + $0x18] sm:$0xff] %v799_v16  ;;  %v778_v21 = vadd.f32 %v1138_v17, %v1098_v14  ;;  %v1100_v22 = vpop.f32.mrf.mxu0 }
 0x178   : > { %v1101_v23 = vadd.f32 %v1100_v22, %v1099_v18  ;;  %v1140_v24 = vpop.f32.mrf.mxu1 }
 0x179   : > { %v800_v25 = vadd.f32 %v778_v21, %v310_v19  ;;  %v1141_v26 = vadd.f32 %v1140_v24, %v1139_v20  ;;  %v1102_v27 = vpop.f32.mrf.mxu0 }
 0x17a   : > { %v1142_v29 = vpop.f32.mrf.mxu1 }
 0x17b   : > { %808 = vst [vmem:[#allocation2 + $0x10] sm:$0xff] %v800_v25  ;;  %v783_v30 = vadd.f32 %v1141_v26, %v1101_v23  ;;  %v1103_v31 = vpop.f32.mrf.mxu0 }
 0x17c   : > { %v1104_v32 = vadd.f32 %v1103_v31, %v1102_v27  ;;  %v1143_v33 = vpop.f32.mrf.mxu1 }
 0x17d   : > { %v801_v34 = vadd.f32 %v783_v30, %v311_v28  ;;  %v1144_v35 = vadd.f32 %v1143_v33, %v1142_v29  ;;  %v1105_v36 = vpop.f32.mrf.mxu0 }
 0x17e   : > { %v1145_v38 = vpop.f32.mrf.mxu1 }
 0x17f   : > { %809 = vst [vmem:[#allocation2 + $0x8] sm:$0xff] %v801_v34  ;;  %v786_v39 = vadd.f32 %v1144_v35, %v1104_v32  ;;  %v1106_v40 = vpop.f32.mrf.mxu0 }
 0x180   : > { %v1107_v41 = vadd.f32 %v1106_v40, %v1105_v36  ;;  %v1146_v42 = vpop.f32.mrf.mxu1 }
 0x181   : > { %v802_v43 = vadd.f32 %v786_v39, %v312_v37  ;;  %v1147_v44 = vadd.f32 %v1146_v42, %v1145_v38  ;;  %v1108_v45 = vpop.f32.mrf.mxu0 }
 0x182   : > { %v1148_v47 = vpop.f32.mrf.mxu1 }
 0x183   : > { %810 = vst [vmem:[#allocation2 + $0x20] sm:$0xff] %v802_v43  ;;  %v791_v48 = vadd.f32 %v1147_v44, %v1107_v41  ;;  %v1109_v49 = vpop.f32.mrf.mxu0 }
 0x184   : > { %v1110_v50 = vadd.f32 %v1109_v49, %v1108_v45  ;;  %v1149_v51 = vpop.f32.mrf.mxu1 }
 0x185   : > { %v803_v52 = vadd.f32 %v791_v48, %v313_v46  ;;  %v1150_v53 = vadd.f32 %v1149_v51, %v1148_v47 }
 0x187   : > { %811 = vst [vmem:[#allocation2 + $0x28] sm:$0xff] %v803_v52  ;;  %v794_v55 = vadd.f32 %v1150_v53, %v1110_v50  ;;  %816 = sbr.rel (%p1063_p0) target bundleno = 406 (0x196), region = 52 }
 0x189   : > { %v804_v56 = vadd.f32 %v794_v55, %v314_v54 }
 0x18b   : > { %812 = vst [vmem:[#allocation2 + $0x38] sm:$0xff] %v804_v56 }
 0x18c   : > { %v817_v57 = vld [vmem:[#allocation2 + $0x30] sm:$0xff]  ;;  %v1064_v58 = vld [vmem:[%s258_s22] ss:$0 sm:$0xff]  ;;  %v819_v62 = vld [vmem:[#allocation2 + $0x18] sm:$0xff] }
 0x18d   : > { %v818_v59 = vld [vmem:[#allocation2] sm:$0xff]  ;;  %v832_v60 = vadd.f32 %v1064_v58, %v817_v57  ;;  %v820_v63 = vld [vmem:[#allocation2 + $0x10] sm:$0xff]  ;;  %v821_v0 = vld [vmem:[#allocation2 + $0x8] sm:$0xff]  ;;  %v834_v1 = vadd.f32 %v1064_v58, %v819_v62 }
 0x18e   : > { %v833_v61 = vadd.f32 %v1064_v58, %v818_v59  ;;  %v835_v2 = vadd.f32 %v1064_v58, %v820_v63  ;;  %v836_v3 = vadd.f32 %v1064_v58, %v821_v0  ;;  %v822_v4 = vld [vmem:[#allocation2 + $0x20] sm:$0xff]  ;;  %v823_v5 = vld [vmem:[#allocation2 + $0x28] sm:$0xff] }
 0x18f   : > { %840 = vst [vmem:[%s1901_s11] sm:$0xff] %v832_v60  ;;  %v837_v7 = vadd.f32 %v1064_v58, %v822_v4  ;;  %v838_v8 = vadd.f32 %v1064_v58, %v823_v5  ;;  %842 = vst [vmem:[%s1901_s11 + $0x10] sm:$0xff] %v834_v1 }
 0x190   : > { %841 = vst [vmem:[%s1901_s11 + $0x8] sm:$0xff] %v833_v61  ;;  %843 = vst [vmem:[%s1901_s11 + $0x18] sm:$0xff] %v835_v2 }
 0x191   : > { %844 = vst [vmem:[%s1901_s11 + $0x20] sm:$0xff] %v836_v3  ;;  %845 = vst [vmem:[%s1901_s11 + $0x28] sm:$0xff] %v837_v7 }
 0x192   : > { %v824_v6 = vld [vmem:[#allocation2 + $0x38] sm:$0xff]  ;;  %846 = vst [vmem:[%s1901_s11 + $0x30] sm:$0xff] %v838_v8 }
 0x193   : > { %v839_v9 = vadd.f32 %v1064_v58, %v824_v6 }
 0x195   : > { %847 = vst [vmem:[%s1901_s11 + $0x38] sm:$0xff] %v839_v9 }
 0x196 PF: > { %s2089_s29 = sld [smem:[#allocation15_spill]]  ;;  %s864_s10 = sshll.u32 %s1901_s11, 4  ;;  %s1970_s10 = int_to_ptr.vmem [resolvable:$true] %s864_s10 }
 0x197   : > { %s2090_s18 = sld [smem:[#allocation23_spill]]  ;;  %s849_s21 = scalar_lea.sflag [#allocation5], %s1893_s15 }
 0x198   : > { %s1437_s26 = scalar_lea.vmem %s1970_s10, 1024  ;;  %p2092_p11 = scmp.ne.s32.totalorder %s2082_s3, 0 }
 0x199   : > { %p1438_p3 = scmp.ne.s32.totalorder %s1970_s10, %s1437_s26  ;;  %s1601_s5 = smov [#allocation9]  }
 0x19a   : > { %s1441_s27 = sshll.u32 %s1601_s5, 4  ;;  %s1442_s27 = int_to_ptr.vmem [resolvable:$false] %s1441_s27 }
 0x19b   : > { %p1439_p1 = pnand %p1438_p3, %p2092_p11  ;;  %s1443_s22 = scalar_lea.vmem %s1442_s27, 2048 }
 0x19c   : > { %s1066_s8 = sshll.u32 %s2089_s29, 7  ;;  %p1444_p6 = scmp.lt.s32.totalorder %s1970_s10, %s1442_s27 }
 0x19d   : > { %s2091_s4 = smov %s2090_s18  ;;  %s1967_s24 = scalar_lea.hbm %s2090_s18, %s1066_s8 }
 0x19e   : > { %p1440_p7 = pneg %p1439_p1  ;;  %p1445_p5 = scmp.lt.s32.totalorder %s1443_s22, %s1437_s26 }
 0x1a0   : > { %p1446_p8 = por %p1445_p5, %p1444_p6 }
 0x1a2   : > { %p1447_p12 = pnand %p1446_p8, %p1440_p7 }
 0x1a4   : > { %1450 = shalt.err (!%p1447_p12)
}
 0x1a5   : > { %s1451_s6 = scalar_lea.hbm %s1967_s24, 1024  ;;  %s1455_s28 = scalar_lea.hbm %s2091_s4, 2048 }
 0x1a6   : > { %p1452_p4 = scmp.ne.s32.totalorder %s1967_s24, %s1451_s6  ;;  %p1456_p10 = scmp.lt.s32.totalorder %s1967_s24, %s2091_s4 }
 0x1a7   : > { %p1457_p2 = scmp.lt.s32.totalorder %s1455_s28, %s1451_s6 }
 0x1a8   : > { %p1453_p9 = pnand %p1452_p4, %p2092_p11 }
 0x1a9   : > { %p1458_p0 = por %p1457_p2, %p1456_p10 }
 0x1aa   : > { %p1454_p13 = pneg %p1453_p9 }
 0x1ac   : > { %p1459_p3 = pnand %p1458_p0, %p1454_p13 }
 0x1ae   : > { %1462 = shalt.err (!%p1459_p3)
}
 0x1af   : > { %s1602_s1 = smov 128   ;;  %s1603_s0 = smov 256  }
 0x1b0   : > { %s1604_s18 = smov 8  }
 0x1b1   : > { %1157 = dma.vmem_to_hbm [thread:$0]  (%p2092_p11), %s1970_s10, 1024, %s1967_s24, %s849_s21, %s1602_s1, %s1603_s0, %s1604_s18  }
 0x1b2 PF: > { %p1174_p1 = scmp.ge.s32.totalorder %s1589_s25, 2  ;;  %s879_s26 = sand.u32 1, %s1537_s12  }
 0x1b3   : > { %p2093_p7 = scmp.ne.s32.totalorder %s2083_s23, 0  ;;  %s880_s5 = scalar_lea.sflag [#allocation5], %s879_s26 }
 0x1b5   : > { %p1170_p6 = pnand %p1174_p1, %p2093_p7 }
 0x1b7   : > { %p1171_p5 = pneg %p1170_p6 }
 0x1b9   : > { %1532 = dma.done.wait (%p1171_p5), %s880_s5, 1024  }
 0x1ba   : > { %1534 = vsyncadd (%p1171_p5), %s880_s5, 4294966272  ;;  %s22_s25 = sadd.s32 1, %s1589_s25   ;;  %s2095_s3 = sld [smem:[#allocation19_spill]] }
 0x1bb   : > { %p2000_p8 = scmp.ge.s32.totalorder %s22_s25, 14   ;;  %s2096_s21 = sld [smem:[#allocation16_spill]] }
 0x1bc   : > { %s2097_s22 = sld [smem:[#allocation17_spill]]  ;;  %s2100_s12 = smov %s1541_s13 }
 0x1bd   : > { %s2098_s23 = sld [smem:[#allocation18_spill]]  ;;  %s2101_s13 = smov %s1545_s14 }
 0x1be   : > { %s2099_s24 = sld [smem:[#allocation20_spill]]  ;;  %s2102_s14 = smov %s1836_s30 }
 0x1bf   : > { %s2103_s15 = smov %s1553_s16  ;;  %s2104_s16 = smov %s1557_s17 }
 0x1c0   : > { %s2105_s17 = smov %s1841_s7  ;;  %s2106_s18 = smov %s1565_s19 }
 0x1c1   : > { %s2107_s19 = smov %s1569_s20  ;;  %s2108_s20 = smov %s2095_s3 }
 0x1c2   :  { %21 = sbr.rel (!%p2000_p8) target bundleno = 16 (0x10), region = 109 }
 0x1c7   :  { %885 = vsyncpa [#allocation4], 1 }
 0x1c8   :  { %887 = vsyncpa [#allocation4 + $0x1], 1 }
 0x1c9   :  { %888 = vsyncpa [#allocation7], 1 }
 0x1ca   :  { %890 = vsyncpa [#allocation7 + $0x1], 1 }
 0x1cb   :  { %891 = vsyncpa [#allocation5], 1 }
 0x1cc   :  { %893 = vsyncpa [#allocation5 + $0x1], 1 }

</bundles_post_ra>
